<compile_context>
chip_gen: v6e
topology: v6e:2x2x1
jax: 0.10.0
libtpu: 0.0.40
codegen_flags: <defaults>
</compile_context>

<pallas_src>
import functools

import jax
import jax.numpy as jnp
from jax import lax
from jax.experimental import pallas as pl
from jax.experimental.pallas import tpu as pltpu

_EPS = 1e-5
_HIGHEST = lax.Precision.HIGHEST


def _round_up(v, m):
    return ((v + m - 1) // m) * m


def _leaky_relu(x, slope=0.5):
    return jnp.where(x >= 0, x, slope * x)


def _log_sigmoid(x):
    # Numerically stable log(sigmoid(x)) = min(x, 0) - log1p(exp(-|x|)).
    return jnp.minimum(x, 0.0) - jnp.log1p(jnp.exp(-jnp.abs(x)))


def _nt_dot(a, b):
    # a: [M, K], b: [P, K] -> [M, P]  (contraction over the last dim of both,
    # i.e. a @ b.T without materializing a transpose of the operands).
    return lax.dot_general(
        a, b, (((1,), (1,)), ((), ())),
        preferred_element_type=jnp.float32, precision=_HIGHEST)


def _bn_fold(h, gamma, beta):
    # Training-mode BatchNorm1d stats (batch mean, biased variance), returned
    # as an affine (scale, shift) so it can be folded into the next Linear.
    mean = jnp.mean(h, axis=0, keepdims=True)
    diff = h - mean
    var = jnp.mean(diff * diff, axis=0, keepdims=True)
    scale = gamma * lax.rsqrt(var + _EPS)
    shift = beta - mean * scale
    return scale, shift


def networklog_dos_kernel(x_ref, vec_ref, wmat_ref, out_ref, *, F, H, RB):
    x = x_ref[...]                                     # [N, F]

    # ---- unpack the packed per-feature vectors ([1, width] each) ----
    g0  = vec_ref[0:1, 0:F]
    be0 = vec_ref[1:2, 0:F]
    b1  = vec_ref[2:3, 0:H]
    g1  = vec_ref[3:4, 0:H]
    be1 = vec_ref[4:5, 0:H]
    b2  = vec_ref[5:6, 0:H]
    g2  = vec_ref[6:7, 0:H]
    be2 = vec_ref[7:8, 0:H]
    b3  = vec_ref[8:9, 0:1]

    # ---- unpack the packed weights (PyTorch [out, in] layout) ----
    w1 = wmat_ref[0:H, 0:F]                            # [H, F]
    w2 = wmat_ref[RB:RB + H, 0:H]                      # [H, H]
    w3 = wmat_ref[2 * RB:2 * RB + 1, 0:H]              # [1, H]

    # ---- bn0 folded into layer1, leakyReLU(0.5) ----
    s0, t0 = _bn_fold(x, g0, be0)
    h = _nt_dot(x, w1 * s0) + (b1 + _nt_dot(t0, w1))   # [N, H]
    h = _leaky_relu(h)

    # ---- bn1 folded into layer2, leakyReLU(0.5) ----
    s1, t1 = _bn_fold(h, g1, be1)
    h = _nt_dot(h, w2 * s1) + (b2 + _nt_dot(t1, w2))   # [N, H]
    h = _leaky_relu(h)

    # ---- bn2 folded into layer3, logsigmoid ----
    # Computed transposed so the result is lane-major ([1, N], lane-dense
    # store) rather than a lane-width-1 [N, 1] masked store.
    s2, t2 = _bn_fold(h, g2, be2)
    z = _nt_dot(w3 * s2, h) + (b3 + _nt_dot(t2, w3))   # [1, N]
    out_ref[...] = _log_sigmoid(z)


def networklog_dos_forward(x, params):
    """x: [N, nb_stocks] float32.  Returns [N, 1] float32."""
    n, f = x.shape
    hid = params["w1"].shape[0]
    lanes = _round_up(max(f, hid, 128), 128)
    rb = _round_up(hid, 8)

    # Pack the 9 tiny per-feature vectors into one lane-dense slab and the
    # 3 small weight matrices into another, so the kernel sees 3 operands
    # (3 DMAs) instead of 13 individually padded tiles.
    vec = jnp.zeros((9, lanes), jnp.float32)
    for row, v in (
        (0, params["g0"]), (1, params["be0"]),
        (2, params["b1"]), (3, params["g1"]), (4, params["be1"]),
        (5, params["b2"]), (6, params["g2"]), (7, params["be2"]),
        (8, params["b3"]),
    ):
        vec = vec.at[row, : v.shape[0]].set(v.astype(jnp.float32))

    wmat = jnp.zeros((2 * rb + 1, lanes), jnp.float32)
    wmat = wmat.at[0:hid, 0:f].set(params["w1"].astype(jnp.float32))
    wmat = wmat.at[rb:rb + hid, 0:hid].set(params["w2"].astype(jnp.float32))
    wmat = wmat.at[2 * rb:2 * rb + 1, 0:hid].set(params["w3"].astype(jnp.float32))

    vmem = pl.BlockSpec(memory_space=pltpu.MemorySpace.VMEM)
    kernel = functools.partial(networklog_dos_kernel, F=f, H=hid, RB=rb)
    out_row = pl.pallas_call(
        kernel,
        out_shape=jax.ShapeDtypeStruct((1, n), jnp.float32),
        in_specs=[vmem, vmem, vmem],
        out_specs=vmem,
        compiler_params=pltpu.CompilerParams(vmem_limit_bytes=32 * 1024 * 1024),
    )(x.astype(jnp.float32), vec, wmat)
    return out_row.T                                   # [N, 1]


def init_params(key, nb_stocks, hidden_size=10):
    """Deterministic synthetic parameter init (matching PyTorch shapes)."""
    H = hidden_size
    ks = jax.random.split(key, 6)

    def linear_init(kw, kb, fan_in, fan_out):
        bound = 1.0 / jnp.sqrt(fan_in)
        w = jax.random.uniform(kw, (fan_out, fan_in), jnp.float32, -bound, bound)
        b = jax.random.uniform(kb, (fan_out,), jnp.float32, -bound, bound)
        return w, b

    w1, b1 = linear_init(ks[0], ks[1], nb_stocks, H)   # layer1: [H, nb_stocks]
    w2, b2 = linear_init(ks[2], ks[3], H, H)           # layer2: [H, H]
    w3, b3 = linear_init(ks[4], ks[5], H, 1)           # layer3: [1, H]

    return {
        "w1": w1, "b1": b1,
        "w2": w2, "b2": b2,
        "w3": w3, "b3": b3,
        # BatchNorm affine params (PyTorch default init: weight=1, bias=0).
        "g0": jnp.ones((nb_stocks,), jnp.float32), "be0": jnp.zeros((nb_stocks,), jnp.float32),
        "g1": jnp.ones((H,), jnp.float32),         "be1": jnp.zeros((H,), jnp.float32),
        "g2": jnp.ones((H,), jnp.float32),         "be2": jnp.zeros((H,), jnp.float32),
    }


def reference_forward(x, params):
    """Pure-JAX reference with identical semantics (for sanity check)."""
    def bn(v, g, b):
        m = jnp.mean(v, axis=0, keepdims=True)
        var = jnp.mean((v - m) ** 2, axis=0, keepdims=True)
        return (v - m) / jnp.sqrt(var + _EPS) * g + b

    def lrelu(v):
        return jnp.where(v >= 0, v, 0.5 * v)

    h = bn(x, params["g0"], params["be0"])
    h = lrelu(jnp.dot(h, params["w1"].T, precision=_HIGHEST) + params["b1"])
    h = bn(h, params["g1"], params["be1"])
    h = lrelu(jnp.dot(h, params["w2"].T, precision=_HIGHEST) + params["b2"])
    h = bn(h, params["g2"], params["be2"])
    h = jnp.dot(h, params["w3"].T, precision=_HIGHEST) + params["b3"]
    return jax.nn.log_sigmoid(h)


if __name__ == "__main__":
    key = jax.random.PRNGKey(0)
    k_x, k_p = jax.random.split(key)

    batch = 8
    nb_stocks = 4
    hidden_size = 10

    x = jax.random.normal(k_x, (batch, nb_stocks), dtype=jnp.float32)
    params = init_params(k_p, nb_stocks, hidden_size)

    out = networklog_dos_forward(x, params)
    out = jax.block_until_ready(out)

    ref = reference_forward(x, params)
    assert out.shape == (batch, 1)
    assert jnp.allclose(out, ref, atol=1e-4, rtol=1e-4)

    print("KERNEL_OK")
</pallas_src>

<mosaic_0001>
module attributes {stable_mosaic.version = 11 : i64} {
  func.func @networklog_dos_kernel(%arg0: memref<8x4xf32, #tpu.memory_space<vmem>>, %arg1: memref<9x128xf32, #tpu.memory_space<vmem>>, %arg2: memref<33x128xf32, #tpu.memory_space<vmem>>, %arg3: memref<1x8xf32, #tpu.memory_space<vmem>>) attributes {dimension_semantics = [], scalar_prefetch = 0 : i64, scratch_operands = 0 : i64, tpu.core_type = #tpu.core_type<tc>} {
    %c0 = arith.constant 0 : index
    %c0_0 = arith.constant 0 : index
    %0 = vector.load %arg0[%c0, %c0_0] : memref<8x4xf32, #tpu.memory_space<vmem>>, vector<8x4xf32>
    %c0_1 = arith.constant 0 : index
    %c0_2 = arith.constant 0 : index
    %1 = vector.load %arg1[%c0_1, %c0_2] : memref<9x128xf32, #tpu.memory_space<vmem>>, vector<1x4xf32>
    %c1 = arith.constant 1 : index
    %c0_3 = arith.constant 0 : index
    %2 = vector.load %arg1[%c1, %c0_3] : memref<9x128xf32, #tpu.memory_space<vmem>>, vector<1x4xf32>
    %c2 = arith.constant 2 : index
    %c0_4 = arith.constant 0 : index
    %3 = vector.load %arg1[%c2, %c0_4] : memref<9x128xf32, #tpu.memory_space<vmem>>, vector<1x10xf32>
    %c3 = arith.constant 3 : index
    %c0_5 = arith.constant 0 : index
    %4 = vector.load %arg1[%c3, %c0_5] : memref<9x128xf32, #tpu.memory_space<vmem>>, vector<1x10xf32>
    %c4 = arith.constant 4 : index
    %c0_6 = arith.constant 0 : index
    %5 = vector.load %arg1[%c4, %c0_6] : memref<9x128xf32, #tpu.memory_space<vmem>>, vector<1x10xf32>
    %c5 = arith.constant 5 : index
    %c0_7 = arith.constant 0 : index
    %6 = vector.load %arg1[%c5, %c0_7] : memref<9x128xf32, #tpu.memory_space<vmem>>, vector<1x10xf32>
    %c6 = arith.constant 6 : index
    %c0_8 = arith.constant 0 : index
    %7 = vector.load %arg1[%c6, %c0_8] : memref<9x128xf32, #tpu.memory_space<vmem>>, vector<1x10xf32>
    %c7 = arith.constant 7 : index
    %c0_9 = arith.constant 0 : index
    %8 = vector.load %arg1[%c7, %c0_9] : memref<9x128xf32, #tpu.memory_space<vmem>>, vector<1x10xf32>
    %c8 = arith.constant 8 : index
    %c0_10 = arith.constant 0 : index
    %9 = vector.load %arg1[%c8, %c0_10] : memref<9x128xf32, #tpu.memory_space<vmem>>, vector<1x1xf32>
    %c0_11 = arith.constant 0 : index
    %c0_12 = arith.constant 0 : index
    %10 = vector.load %arg2[%c0_11, %c0_12] : memref<33x128xf32, #tpu.memory_space<vmem>>, vector<10x4xf32>
    %c16 = arith.constant 16 : index
    %c0_13 = arith.constant 0 : index
    %11 = vector.load %arg2[%c16, %c0_13] : memref<33x128xf32, #tpu.memory_space<vmem>>, vector<10x10xf32>
    %c32 = arith.constant 32 : index
    %c0_14 = arith.constant 0 : index
    %12 = vector.load %arg2[%c32, %c0_14] : memref<33x128xf32, #tpu.memory_space<vmem>>, vector<1x10xf32>
    %cst = arith.constant dense<0.000000e+00> : vector<4xf32>
    %13 = vector.multi_reduction <add>, %0, %cst [0] : vector<8x4xf32> to vector<4xf32>
    %14 = vector.shape_cast %13 : vector<4xf32> to vector<1x4xf32>
    %cst_15 = arith.constant 8.000000e+00 : f32
    %15 = vector.broadcast %cst_15 : f32 to vector<1x4xf32>
    %16 = arith.divf %14, %15 : vector<1x4xf32>
    %17 = vector.broadcast %16 : vector<1x4xf32> to vector<8x4xf32>
    %18 = arith.subf %0, %17 : vector<8x4xf32>
    %19 = arith.mulf %18, %18 : vector<8x4xf32>
    %cst_16 = arith.constant dense<0.000000e+00> : vector<4xf32>
    %20 = vector.multi_reduction <add>, %19, %cst_16 [0] : vector<8x4xf32> to vector<4xf32>
    %21 = vector.shape_cast %20 : vector<4xf32> to vector<1x4xf32>
    %cst_17 = arith.constant 8.000000e+00 : f32
    %22 = vector.broadcast %cst_17 : f32 to vector<1x4xf32>
    %23 = arith.divf %21, %22 : vector<1x4xf32>
    %cst_18 = arith.constant 9.99999974E-6 : f32
    %24 = vector.broadcast %cst_18 : f32 to vector<1x4xf32>
    %25 = arith.addf %23, %24 : vector<1x4xf32>
    %26 = math.rsqrt %25 : vector<1x4xf32>
    %27 = arith.mulf %1, %26 : vector<1x4xf32>
    %28 = arith.mulf %16, %27 : vector<1x4xf32>
    %29 = arith.subf %2, %28 : vector<1x4xf32>
    %30 = vector.broadcast %27 : vector<1x4xf32> to vector<10x4xf32>
    %31 = arith.mulf %10, %30 : vector<10x4xf32>
    %cst_19 = arith.constant dense<0.000000e+00> : vector<8x10xf32>
    %32 = tpu.matmul %0, %31, %cst_19 {dimension_numbers = #tpu.dot_dimension_numbers<[1], [1], [0], [0], [0, 0, 1, 0], [], []>, precision = #tpu.contract_precision<fp32>} : vector<8x4xf32>, vector<10x4xf32>, vector<8x10xf32> -> vector<8x10xf32>
    %cst_20 = arith.constant dense<0.000000e+00> : vector<1x10xf32>
    %33 = tpu.matmul %29, %10, %cst_20 {dimension_numbers = #tpu.dot_dimension_numbers<[1], [1], [0], [0], [0, 0, 1, 0], [], []>, precision = #tpu.contract_precision<fp32>} : vector<1x4xf32>, vector<10x4xf32>, vector<1x10xf32> -> vector<1x10xf32>
    %34 = arith.addf %3, %33 : vector<1x10xf32>
    %35 = vector.broadcast %34 : vector<1x10xf32> to vector<8x10xf32>
    %36 = arith.addf %32, %35 : vector<8x10xf32>
    %cst_21 = arith.constant 0.000000e+00 : f32
    %37 = vector.broadcast %cst_21 : f32 to vector<8x10xf32>
    %38 = arith.cmpf oge, %36, %37 : vector<8x10xf32>
    %cst_22 = arith.constant 5.000000e-01 : f32
    %39 = vector.broadcast %cst_22 : f32 to vector<8x10xf32>
    %40 = arith.mulf %39, %36 : vector<8x10xf32>
    %41 = arith.select %38, %36, %40 : vector<8x10xi1>, vector<8x10xf32>
    %cst_23 = arith.constant dense<0.000000e+00> : vector<10xf32>
    %42 = vector.multi_reduction <add>, %41, %cst_23 [0] : vector<8x10xf32> to vector<10xf32>
    %43 = vector.shape_cast %42 : vector<10xf32> to vector<1x10xf32>
    %cst_24 = arith.constant 8.000000e+00 : f32
    %44 = vector.broadcast %cst_24 : f32 to vector<1x10xf32>
    %45 = arith.divf %43, %44 : vector<1x10xf32>
    %46 = vector.broadcast %45 : vector<1x10xf32> to vector<8x10xf32>
    %47 = arith.subf %41, %46 : vector<8x10xf32>
    %48 = arith.mulf %47, %47 : vector<8x10xf32>
    %cst_25 = arith.constant dense<0.000000e+00> : vector<10xf32>
    %49 = vector.multi_reduction <add>, %48, %cst_25 [0] : vector<8x10xf32> to vector<10xf32>
    %50 = vector.shape_cast %49 : vector<10xf32> to vector<1x10xf32>
    %cst_26 = arith.constant 8.000000e+00 : f32
    %51 = vector.broadcast %cst_26 : f32 to vector<1x10xf32>
    %52 = arith.divf %50, %51 : vector<1x10xf32>
    %cst_27 = arith.constant 9.99999974E-6 : f32
    %53 = vector.broadcast %cst_27 : f32 to vector<1x10xf32>
    %54 = arith.addf %52, %53 : vector<1x10xf32>
    %55 = math.rsqrt %54 : vector<1x10xf32>
    %56 = arith.mulf %4, %55 : vector<1x10xf32>
    %57 = arith.mulf %45, %56 : vector<1x10xf32>
    %58 = arith.subf %5, %57 : vector<1x10xf32>
    %59 = vector.broadcast %56 : vector<1x10xf32> to vector<10x10xf32>
    %60 = arith.mulf %11, %59 : vector<10x10xf32>
    %cst_28 = arith.constant dense<0.000000e+00> : vector<8x10xf32>
    %61 = tpu.matmul %41, %60, %cst_28 {dimension_numbers = #tpu.dot_dimension_numbers<[1], [1], [0], [0], [0, 0, 1, 0], [], []>, precision = #tpu.contract_precision<fp32>} : vector<8x10xf32>, vector<10x10xf32>, vector<8x10xf32> -> vector<8x10xf32>
    %cst_29 = arith.constant dense<0.000000e+00> : vector<1x10xf32>
    %62 = tpu.matmul %58, %11, %cst_29 {dimension_numbers = #tpu.dot_dimension_numbers<[1], [1], [0], [0], [0, 0, 1, 0], [], []>, precision = #tpu.contract_precision<fp32>} : vector<1x10xf32>, vector<10x10xf32>, vector<1x10xf32> -> vector<1x10xf32>
    %63 = arith.addf %6, %62 : vector<1x10xf32>
    %64 = vector.broadcast %63 : vector<1x10xf32> to vector<8x10xf32>
    %65 = arith.addf %61, %64 : vector<8x10xf32>
    %cst_30 = arith.constant 0.000000e+00 : f32
    %66 = vector.broadcast %cst_30 : f32 to vector<8x10xf32>
    %67 = arith.cmpf oge, %65, %66 : vector<8x10xf32>
    %cst_31 = arith.constant 5.000000e-01 : f32
    %68 = vector.broadcast %cst_31 : f32 to vector<8x10xf32>
    %69 = arith.mulf %68, %65 : vector<8x10xf32>
    %70 = arith.select %67, %65, %69 : vector<8x10xi1>, vector<8x10xf32>
    %cst_32 = arith.constant dense<0.000000e+00> : vector<10xf32>
    %71 = vector.multi_reduction <add>, %70, %cst_32 [0] : vector<8x10xf32> to vector<10xf32>
    %72 = vector.shape_cast %71 : vector<10xf32> to vector<1x10xf32>
    %cst_33 = arith.constant 8.000000e+00 : f32
    %73 = vector.broadcast %cst_33 : f32 to vector<1x10xf32>
    %74 = arith.divf %72, %73 : vector<1x10xf32>
    %75 = vector.broadcast %74 : vector<1x10xf32> to vector<8x10xf32>
    %76 = arith.subf %70, %75 : vector<8x10xf32>
    %77 = arith.mulf %76, %76 : vector<8x10xf32>
    %cst_34 = arith.constant dense<0.000000e+00> : vector<10xf32>
    %78 = vector.multi_reduction <add>, %77, %cst_34 [0] : vector<8x10xf32> to vector<10xf32>
    %79 = vector.shape_cast %78 : vector<10xf32> to vector<1x10xf32>
    %cst_35 = arith.constant 8.000000e+00 : f32
    %80 = vector.broadcast %cst_35 : f32 to vector<1x10xf32>
    %81 = arith.divf %79, %80 : vector<1x10xf32>
    %cst_36 = arith.constant 9.99999974E-6 : f32
    %82 = vector.broadcast %cst_36 : f32 to vector<1x10xf32>
    %83 = arith.addf %81, %82 : vector<1x10xf32>
    %84 = math.rsqrt %83 : vector<1x10xf32>
    %85 = arith.mulf %7, %84 : vector<1x10xf32>
    %86 = arith.mulf %74, %85 : vector<1x10xf32>
    %87 = arith.subf %8, %86 : vector<1x10xf32>
    %88 = arith.mulf %12, %85 : vector<1x10xf32>
    %cst_37 = arith.constant dense<0.000000e+00> : vector<1x8xf32>
    %89 = tpu.matmul %88, %70, %cst_37 {dimension_numbers = #tpu.dot_dimension_numbers<[1], [1], [0], [0], [0, 0, 1, 0], [], []>, precision = #tpu.contract_precision<fp32>} : vector<1x10xf32>, vector<8x10xf32>, vector<1x8xf32> -> vector<1x8xf32>
    %cst_38 = arith.constant dense<0.000000e+00> : vector<1x1xf32>
    %90 = tpu.matmul %87, %12, %cst_38 {dimension_numbers = #tpu.dot_dimension_numbers<[1], [1], [0], [0], [0, 0, 1, 0], [], []>, precision = #tpu.contract_precision<fp32>} : vector<1x10xf32>, vector<1x10xf32>, vector<1x1xf32> -> vector<1x1xf32>
    %91 = arith.addf %9, %90 : vector<1x1xf32>
    %92 = vector.broadcast %91 : vector<1x1xf32> to vector<1x8xf32>
    %93 = arith.addf %89, %92 : vector<1x8xf32>
    %cst_39 = arith.constant 0.000000e+00 : f32
    %94 = vector.broadcast %cst_39 : f32 to vector<1x8xf32>
    %95 = arith.minimumf %93, %94 : vector<1x8xf32>
    %96 = math.absf %93 : vector<1x8xf32>
    %cst_40 = arith.constant 0.000000e+00 : f32
    %97 = vector.broadcast %cst_40 : f32 to vector<1x8xf32>
    %98 = arith.subf %97, %96 : vector<1x8xf32>
    %99 = math.exp %98 : vector<1x8xf32>
    %100 = math.log1p %99 : vector<1x8xf32>
    %101 = arith.subf %95, %100 : vector<1x8xf32>
    %c0_41 = arith.constant 0 : index
    %c0_42 = arith.constant 0 : index
    %102 = vector.load %arg3[%c0_41, %c0_42] : memref<1x8xf32, #tpu.memory_space<vmem>>, vector<1x8xf32>
    tpu.vector_store %arg3[%c0_41, %c0_42], %101 {strides = array<i32>} : memref<1x8xf32, #tpu.memory_space<vmem>>, vector<1x8xf32>,
    return
  }
}

</mosaic_0001>

<bundles_post_ra>
// kernel: tpu_custom_call.1
= control target key start
LH: loop header
LB: loop body
LE: loop exit
PB: predicated region body
PF: predicated region fallthrough
CT: control target
= control target key end

     0   :  { %8 = vsyncpa [#allocation3], 0  ;;  %s3178_s0 = inlined_call_operand.vmem [shape: f32[8,4], index: 0, kind: input, shape index: {}]   ;;  %s3179_s1 = inlined_call_operand.hbm [shape: f32[9,128], index: 1, kind: input, shape index: {}]   ;;  %s3180_s2 = inlined_call_operand.hbm [shape: f32[33,128], index: 2, kind: input, shape index: {}]   ;;  %s3181_s3 = inlined_call_operand.hbm [shape: f32[1,8], index: 3, kind: output, shape index: {}]  }
   0x1   :  { %9 = vsyncpa [#allocation6], 0 }
   0x2   :  { %10 = vsyncpa [#allocation4], 0  ;;  %s2894_s12 = smov [#allocation2]  }
   0x3   :  { %s18_s13 = sshll.u32 %s2894_s12, 4  ;;  %s19_s13 = int_to_ptr.vmem [resolvable:$true] %s18_s13 }
   0x4   :  { %s2836_s14 = scalar_lea.vmem %s19_s13, 256  ;;  %p2841_p1 = scmp.lt.s32.totalorder %s19_s13, %s19_s13 }
   0x5   :  { %p2837_p0 = scmp.ne.s32.totalorder %s19_s13, %s2836_s14  ;;  %p2842_p2 = scmp.lt.s32.totalorder %s2836_s14, %s2836_s14 }
   0x7   :  { %p2843_p3 = por %p2842_p2, %p2841_p1 }
   0x9   :  { %p2844_p4 = pnand %p2843_p3, %p2837_p0 }
   0xb   :  { %2847 = shalt.err (!%p2844_p4)
}
   0xc   :  { %s2895_s15 = smov 128   ;;  %s2896_s16 = smov 8  }
   0xd   :  { %24 = dma.hbm_to_vmem [thread:$0]  %s3179_s1, 256, %s19_s13, [#allocation3], %s2895_s15, %s2895_s15, %s2896_s16  }
   0xe   :  { %s2897_s19 = smov [#allocation5]  }
   0xf   :  { %s30_s20 = sshll.u32 %s2897_s19, 4  ;;  %s31_s20 = int_to_ptr.vmem [resolvable:$true] %s30_s20 }
  0x10   :  { %s2856_s21 = scalar_lea.vmem %s31_s20, 640  ;;  %p2861_p6 = scmp.lt.s32.totalorder %s31_s20, %s31_s20 }
  0x11   :  { %p2857_p5 = scmp.ne.s32.totalorder %s31_s20, %s2856_s21  ;;  %p2862_p7 = scmp.lt.s32.totalorder %s2856_s21, %s2856_s21 }
  0x13   :  { %p2863_p8 = por %p2862_p7, %p2861_p6 }
  0x15   :  { %p2864_p9 = pnand %p2863_p8, %p2857_p5 }
  0x17   :  { %2867 = shalt.err (!%p2864_p9)
}
  0x18   :  { %36 = dma.hbm_to_vmem [thread:$0]  %s3180_s2, 640, %s31_s20, [#allocation6], %s2895_s15, %s2895_s15, %s2896_s16  }
  0x19   :  { %2888 = dma.done.wait [#allocation3], 256  }
  0x1a   :  { %2889 = vsyncadd [#allocation3], 4294967040 }
  0x1b   :  { %2890 = dma.done.wait [#allocation6], 640  }
  0x1c   :  { %2891 = vsyncadd [#allocation6], 4294966656  ;;  %v2898_v0 = vmov 0.0   ;;  %vm2899_vm0 = vmmov 0   ;;  %vm58_vm1 = vcmask 31744   ;;  %v53_v2 = vld [vmem:[#allocation5] sm:$0xff]  ;;  %v83_v36 = vlaneseq }
  0x1d   :  { %2611 = vmatprep.subr.mxu0 %v2898_v0  ;;  %2618 = vmatprep.subr.mxu1 %v2898_v0  ;;  %v54_v1 = vld [vmem:[#allocation5 + $0x8] sm:$0x3]  ;;  %v43_v3 = vld [vmem:[%s3178_s0] sm:$0xff]  ;;  %v93_v5 = vsel %vm58_vm1, %v53_v2, 0  ;;  %vm1033_vm2 = vcmask 80896   ;;  %vm2032_vm5 = vcmask 73728  }
  0x1e   :  { %2615 = vmatprep.mubr.msk.f32.mxu0 %vm2899_vm0, %v2898_v0  ;;  %2622 = vmatprep.mubr.msk.f32.mxu1 %vm2899_vm0, %v2898_v0  ;;  %v96_v4 = vsel %vm58_vm1, %v54_v1, 0  ;;  %v2941_v7 = vand.u32 4294901760, %v93_v5  ;;  %v59_v8 = vsel %vm58_vm1, %v43_v3, 0.0  ;;  %v2945_v9 = vsel %vm58_vm1, %v43_v3, 0  ;;  %v44_v38 = vld [vmem:[#allocation2] sm:$0x1] }
  0x1f   :  { %v2939_v6 = vand.u32 4294901760, %v96_v4  ;;  %v60_v10 = vrot.slane %v59_v8, 4  ;;  %v84_v37 = vshrl.u32 %v83_v36, 7  ;;  %v45_v42 = vld [vmem:[#allocation2 + $0x1] sm:$0x1]  ;;  %v638_v63 = vand.u32 4294901760, %v2945_v9 }
  0x20   :  { %v2952_v12 = vsub.f32 %v93_v5, %v2941_v7  ;;  %s2901_s0 = smov [#allocation7]   ;;  %vm2509_vm7 = vcmask 57344  }
  0x21   :  { %2612 = vmatpush3.xpose.msra.mxu0 %v2939_v6  ;;  %v2949_v11 = vsub.f32 %v96_v4, %v2939_v6  ;;  %v61_v13 = vadd.f32 %v60_v10, %v59_v8  ;;  %v2968_v39 = vsub.s32 0, %v84_v37  ;;  %v3046_v8 = vld [vmem:[#allocation5 + $0x18] sm:$0x3]  ;;  %v46_v37 = vld [vmem:[#allocation2 + $0x2] sm:$0x1]  ;;  %s2517_s24 = sshll.u32 %s2901_s0, 4  ;;  %s2518_s24 = int_to_ptr.vmem [resolvable:$true] %s2517_s24 }
  0x22   :  { %2613 = vmatprep.subr.mxu0 %v2898_v0  ;;  %v213_v15 = vand.u32 4294901760, %v2952_v12  ;;  %s2868_s25 = scalar_lea.vmem %s2518_s24, 16  ;;  %s2872_s26 = scalar_lea.vmem %s2518_s24, 32 }
  0x23   :  { %v206_v14 = vand.u32 4294901760, %v2949_v11  ;;  %v62_v16 = vrot.slane %v61_v13, 2  ;;  %p2869_p10 = scmp.ne.s32.totalorder %s2518_s24, %s2868_s25  ;;  %p2873_p11 = scmp.lt.s32.totalorder %s2518_s24, %s2518_s24 }
  0x24   :  { %v214_v18 = vsub.f32 %v2952_v12, %v213_v15  ;;  %p2874_p12 = scmp.lt.s32.totalorder %s2872_s26, %s2868_s25 }
  0x25   :  { %v207_v17 = vsub.f32 %v2949_v11, %v206_v14  ;;  %2614 = vmatpush3.xpose.msra.mxu0 %v2941_v7  ;;  %v63_v19 = vadd.f32 %v62_v16, %v61_v13 }
  0x26   :  { %2625 = vmatprep.subr.mxu0 %v2898_v0  ;;  %v215_v22 = vand.u32 4294901760, %v214_v18  ;;  %p2875_p13 = por %p2874_p12, %p2873_p11 }
  0x27   :  { %v208_v20 = vand.u32 4294901760, %v207_v17  ;;  %v64_v21 = vrot.slane %v63_v19, 1 }
  0x28   :  { %p2876_p0 = pnand %p2875_p13, %p2869_p10 }
  0x29   :  { %2619 = vmatpush3.xpose.msra.mxu1 %v208_v20  ;;  %v65_v23 = vadd.f32 %v64_v21, %v63_v19 }
  0x2a   :  { %2620 = vmatprep.subr.mxu1 %v2898_v0 }
  0x2b   :  { %v67_v24 = vmul.f32 0.125, %v65_v23 }
  0x2d   :  { %2621 = vmatpush3.xpose.msra.mxu1 %v215_v22  ;;  %v68_v25 = vsub.f32 %v43_v3, %v67_v24  ;;  %v639_v3 = vsub.f32 %v2945_v9, %v638_v63  ;;  %v1070_v9 = vsel %vm1033_vm2, %v3046_v8, 0 }
  0x2e   :  { %2632 = vmatprep.subr.mxu1 %v2898_v0  ;;  %v3050_v10 = vand.u32 4294901760, %v1070_v9 }
  0x2f   :  { %v69_v26 = vmul.f32 %v68_v25, %v68_v25  ;;  %v640_v5 = vand.u32 4294901760, %v639_v3 }
  0x31   :  { %v70_v27 = vsel %vm58_vm1, %v69_v26, 0.0 }
  0x32   :  { %v71_v28 = vrot.slane %v70_v27, 4 }
  0x34   :  { %v72_v29 = vadd.f32 %v71_v28, %v70_v27 }
  0x36   :  { %v73_v30 = vrot.slane %v72_v29, 2 }
  0x38   :  { %v74_v31 = vadd.f32 %v73_v30, %v72_v29 }
  0x3a   :  { %v75_v32 = vrot.slane %v74_v31, 1 }
  0x3c   :  { %v76_v33 = vadd.f32 %v75_v32, %v74_v31 }
  0x3e   :  { %v77_v34 = vmul.f32 0.125, %v76_v33 }
  0x40   :  { %v78_v35 = vadd.f32 1e-05, %v77_v34 }
  0x42   :  { %2818 = vrsqrt.f32 %v78_v35 }
  0x4f   :  { %v2819_v40 = vpop.eup %2818 }
  0x50   :  { %v80_v41 = vmul.f32 %v2819_v40, %v44_v38 }
  0x52   :  { %v81_v43 = vmul.f32 %v80_v41, %v67_v24  ;;  %v86_v44 = vrot.slane %v80_v41, %v2968_v39 }
  0x54   :  { %v82_v45 = vsub.f32 %v45_v42, %v81_v43  ;;  %v88_v46 = vmul.f32 %v86_v44, %v54_v1  ;;  %v87_v47 = vmul.f32 %v86_v44, %v53_v2 }
  0x56   :  { %v90_v48 = vsel %vm58_vm1, %v82_v45, 0  ;;  %v569_v49 = vsel %vm58_vm1, %v88_v46, 0  ;;  %v566_v50 = vsel %vm58_vm1, %v87_v47, 0 }
  0x57   :  { %v165_v51 = vand.u32 4294901760, %v90_v48  ;;  %v2974_v52 = vand.u32 4294901760, %v569_v49  ;;  %v603_v56 = vand.u32 4294901760, %v566_v50 }
  0x59   :  { %v166_v53 = vsub.f32 %v90_v48, %v165_v51  ;;  %2623 = vmatmul.mubr.f32.vlgmr.msra.gmra.mxu1 %v165_v51  ;;  %v2981_v55 = vsub.f32 %v569_v49, %v2974_v52  ;;  %v2986_v60 = vsub.f32 %v566_v50, %v603_v56 }
  0x5a   :  { %2633 = vmatpush3.xpose.msra.mxu1 %v2939_v6  ;;  %2636 = vmatprep.mubr.msk.f32.mxu1 %vm2899_vm0, %v2898_v0 }
  0x5b   :  { %v167_v54 = vand.u32 4294901760, %v166_v53  ;;  %2634 = vmatprep.subr.mxu1 %v2898_v0  ;;  %v679_v59 = vand.u32 4294901760, %v2981_v55  ;;  %v686_v62 = vand.u32 4294901760, %v2986_v60 }
  0x5d   :  { %v168_v57 = vsub.f32 %v166_v53, %v167_v54  ;;  %v680_v61 = vsub.f32 %v2981_v55, %v679_v59  ;;  %v687_v2 = vsub.f32 %v2986_v60, %v686_v62 }
  0x5e   :  { %2635 = vmatpush3.xpose.msra.mxu1 %v2941_v7 }
  0x5f   :  { %v169_v58 = vand.u32 4294901760, %v168_v57  ;;  %2646 = vmatprep.subr.mxu1 %v2898_v0  ;;  %v681_v1 = vand.u32 4294901760, %v680_v61  ;;  %v688_v4 = vand.u32 4294901760, %v687_v2 }
  0x61   :  { %2616 = vmatmul.mubr.f32.vlgmr.msra.gmra.mxu0 %v169_v58  ;;  %2637 = vmatmul.mubr.f32.vlgmr.msra.gmra.mxu1 %v167_v54 }
  0x62   :  { %2626 = vmatpush3.xpose.msra.mxu0 %v2949_v11  ;;  %2629 = vmatprep.mubr.msk.f32.mxu0 %vm2899_vm0, %v2898_v0  ;;  %v3053_v11 = vsub.f32 %v1070_v9, %v3050_v10 }
  0x63   :  { %2627 = vmatprep.subr.mxu0 %v2898_v0  ;;  %2647 = vmatpush3.xpose.msra.mxu1 %v2939_v6  ;;  %v641_v6 = vsub.f32 %v639_v3, %v640_v5 }
  0x64   :  { %2648 = vmatprep.subr.mxu1 %v2898_v0  ;;  %2650 = vmatprep.mubr.msk.f32.mxu1 %vm2899_vm0, %v2898_v0 }
  0x66   :  { %2628 = vmatpush3.xpose.msra.mxu0 %v2952_v12  ;;  %v3055_v12 = vld [vmem:[#allocation5 + $0x10] sm:$0xff] }
  0x67   :  { %2639 = vmatprep.subr.mxu0 %v2898_v0  ;;  %2649 = vmatpush3.xpose.msra.mxu1 %v2941_v7  ;;  %v642_v7 = vand.u32 4294901760, %v641_v6  ;;  %v1067_v13 = vsel %vm1033_vm2, %v3055_v12, 0 }
  0x68   :  { %2660 = vmatprep.subr.mxu1 %v2898_v0 }
  0x69   :  { %2630 = vmatmul.mubr.f32.vlgmr.msra.gmra.mxu0 %v166_v53 }
  0x6a   :  { %2640 = vmatpush3.xpose.msra.mxu0 %v206_v14  ;;  %2643 = vmatprep.mubr.msk.f32.mxu0 %vm2899_vm0, %v2898_v0  ;;  %v1180_v14 = vand.u32 4294901760, %v3053_v11 }
  0x6b   :  { %2641 = vmatprep.subr.mxu0 %v2898_v0  ;;  %2651 = vmatmul.mubr.f32.vlgmr.msra.gmra.mxu1 %v165_v51 }
  0x6c   :  { %2661 = vmatpush3.xpose.msra.mxu1 %v681_v1  ;;  %2664 = vmatprep.mubr.msk.f32.mxu1 %vm2899_vm0, %v2898_v0  ;;  %v1181_v16 = vsub.f32 %v3053_v11, %v1180_v14 }
  0x6d   :  { %2662 = vmatprep.subr.mxu1 %v2898_v0 }
  0x6e   :  { %2642 = vmatpush3.xpose.msra.mxu0 %v213_v15  ;;  %v3062_v15 = vand.u32 4294901760, %v1067_v13  ;;  %v1182_v18 = vand.u32 4294901760, %v1181_v16 }
  0x6f   :  { %2653 = vmatprep.subr.mxu0 %v2898_v0 }
  0x70   :  { %2663 = vmatpush3.xpose.msra.mxu1 %v688_v4  ;;  %v3068_v17 = vsub.f32 %v1067_v13, %v3062_v15 }
  0x71   :  { %2644 = vmatmul.mubr.f32.vlgmr.msra.gmra.mxu0 %v165_v51  ;;  %2674 = vmatprep.subr.mxu1 %v2898_v0 }
  0x72   :  { %2654 = vmatpush3.xpose.msra.mxu0 %v2974_v52  ;;  %2657 = vmatprep.mubr.msk.f32.mxu0 %vm2899_vm0, %v2898_v0  ;;  %v1187_v19 = vand.u32 4294901760, %v3068_v17 }
  0x73   :  { %2655 = vmatprep.subr.mxu0 %v2898_v0  ;;  %2665 = vmatmul.mubr.f32.vlgmr.msra.gmra.mxu1 %v638_v63 }
  0x74   :  { %2675 = vmatpush3.xpose.msra.mxu1 %v2974_v52  ;;  %2678 = vmatprep.mubr.msk.f32.mxu1 %vm2899_vm0, %v2898_v0  ;;  %v1188_v20 = vsub.f32 %v3068_v17, %v1187_v19 }
  0x75   :  { %2676 = vmatprep.subr.mxu1 %v2898_v0 }
  0x76   :  { %2656 = vmatpush3.xpose.msra.mxu0 %v603_v56  ;;  %v1189_v21 = vand.u32 4294901760, %v1188_v20 }
  0x77   :  { %2667 = vmatprep.subr.mxu0 %v2898_v0 }
  0x78   :  { %2677 = vmatpush3.xpose.msra.mxu1 %v603_v56 }
  0x79   :  { %2658 = vmatmul.mubr.f32.vlgmr.msra.gmra.mxu0 %v642_v7  ;;  %2688 = vmatprep.subr.mxu1 %v2898_v0 }
  0x7a   :  { %2668 = vmatpush3.xpose.msra.mxu0 %v2981_v55  ;;  %2671 = vmatprep.mubr.msk.f32.mxu0 %vm2899_vm0, %v2898_v0 }
  0x7b   :  { %2669 = vmatprep.subr.mxu0 %v2898_v0  ;;  %2679 = vmatmul.mubr.f32.vlgmr.msra.gmra.mxu1 %v640_v5 }
  0x7c   :  { %2689 = vmatpush3.xpose.msra.mxu1 %v2974_v52  ;;  %2692 = vmatprep.mubr.msk.f32.mxu1 %vm2899_vm0, %v2898_v0 }
  0x7d   :  { %2690 = vmatprep.subr.mxu1 %v2898_v0 }
  0x7e   :  { %2670 = vmatpush3.xpose.msra.mxu0 %v2986_v60 }
  0x7f   :  { %2681 = vmatprep.subr.mxu0 %v2898_v0 }
  0x80   :  { %2691 = vmatpush3.xpose.msra.mxu1 %v603_v56 }
  0x81   :  { %2672 = vmatmul.mubr.f32.vlgmr.msra.gmra.mxu0 %v639_v3  ;;  %2702 = vmatprep.subr.mxu1 %v2898_v0 }
  0x82   :  { %2682 = vmatpush3.xpose.msra.mxu0 %v679_v59  ;;  %2685 = vmatprep.mubr.msk.f32.mxu0 %vm2899_vm0, %v2898_v0 }
  0x83   :  { %2683 = vmatprep.subr.mxu0 %v2898_v0  ;;  %2693 = vmatmul.mubr.f32.vlgmr.msra.gmra.mxu1 %v638_v63 }
  0x84   :  { %2706 = vmatprep.mubr.msk.f32.mxu1 %vm2899_vm0, %v2898_v0  ;;  %2703 = vmatpush3.xpose.msra.mxu1 %v1182_v18 }
  0x85   :  { %2704 = vmatprep.subr.mxu1 %v2898_v0 }
  0x86   :  { %2684 = vmatpush3.xpose.msra.mxu0 %v686_v62 }
  0x87   :  { %2695 = vmatprep.subr.mxu0 %v2898_v0 }
  0x88   :  { %2705 = vmatpush3.xpose.msra.mxu1 %v1189_v21 }
  0x89   :  { %2686 = vmatmul.mubr.f32.vlgmr.msra.gmra.mxu0 %v638_v63  ;;  %2716 = vmatprep.subr.mxu1 %v2898_v0 }
  0x8a   :  { %2699 = vmatprep.mubr.msk.f32.mxu0 %vm2899_vm0, %v2898_v0  ;;  %2696 = vmatpush3.xpose.msra.mxu0 %v3050_v10 }
  0x8b   :  { %2697 = vmatprep.subr.mxu0 %v2898_v0 }
  0x8e   :  { %2698 = vmatpush3.xpose.msra.mxu0 %v3062_v15 }
  0x8f   :  { %2709 = vmatprep.subr.mxu0 %v2898_v0 }
 0x119   :  { %v252_v22 = vpop.f32.mrf.mxu1 }
 0x11b   :  { %v2624_v23 = vpop.f32.mrf.mxu1 }
 0x121   :  { %v171_v24 = vpop.f32.mrf.mxu0  ;;  %v403_v25 = vpop.f32.mrf.mxu1 }
 0x122   :  { %v253_v29 = vadd.f32 %v252_v22, %v171_v24 }
 0x123   :  { %v2617_v26 = vpop.f32.mrf.mxu0  ;;  %v2638_v27 = vpop.f32.mrf.mxu1 }
 0x124   :  { %v47_v27 = vld [vmem:[#allocation2 + $0x3] sm:$0x1] }
 0x129   :  { %v328_v28 = vpop.f32.mrf.mxu0 }
 0x12a   :  { %v329_v32 = vadd.f32 %v328_v28, %v253_v29 }
 0x12b   :  { %v2631_v30 = vpop.f32.mrf.mxu0  ;;  %v553_v31 = vpop.f32.mrf.mxu1 }
 0x12c   :  { %v404_v34 = vadd.f32 %v403_v25, %v329_v32  ;;  %v48_v30 = vld [vmem:[#allocation2 + $0x4] sm:$0x1] }
 0x12d   :  { %v2652_v33 = vpop.f32.mrf.mxu1 }
 0x131   :  { %v480_v35 = vpop.f32.mrf.mxu0 }
 0x132   :  { %v481_v36 = vadd.f32 %v480_v35, %v404_v34 }
 0x133   :  { %v2645_v38 = vpop.f32.mrf.mxu0  ;;  %v725_v40 = vpop.f32.mrf.mxu1 }
 0x134   :  { %v554_v41 = vadd.f32 %v553_v31, %v481_v36 }
 0x135   :  { %v2666_v42 = vpop.f32.mrf.mxu1 }
 0x136   :  { %v557_v43 = vadd.f32 %v554_v41, %v46_v37 }
 0x138   :  { %v561_v45 = vrot.slane %v557_v43, %v2968_v39 }
 0x139   :  { %v644_v44 = vpop.f32.mrf.mxu0 }
 0x13a   :  { %v645_v49 = vadd.f32 %v644_v44, %v561_v45 }
 0x13b   :  { %v2659_v46 = vpop.f32.mrf.mxu0  ;;  %v876_v47 = vpop.f32.mrf.mxu1 }
 0x13c   :  { %v726_v51 = vadd.f32 %v725_v40, %v645_v49 }
 0x13d   :  { %v2680_v48 = vpop.f32.mrf.mxu1 }
 0x141   :  { %v801_v50 = vpop.f32.mrf.mxu0 }
 0x142   :  { %v802_v54 = vadd.f32 %v801_v50, %v726_v51 }
 0x143   :  { %v2673_v52 = vpop.f32.mrf.mxu0  ;;  %v1026_v53 = vpop.f32.mrf.mxu1 }
 0x144   :  { %v877_v56 = vadd.f32 %v876_v47, %v802_v54 }
 0x145   :  { %v2694_v55 = vpop.f32.mrf.mxu1 }
 0x149   :  { %v953_v57 = vpop.f32.mrf.mxu0 }
 0x14a   :  { %v954_v58 = vadd.f32 %v953_v57, %v877_v56 }
 0x14b   :  { %v2687_v59 = vpop.f32.mrf.mxu0 }
 0x14c   :  { %v1027_v60 = vadd.f32 %v1026_v53, %v954_v58 }
 0x14e   :  { %vm1030_vm3 = vcmp.ge.f32.partialorder %v1027_v60, 0.0  ;;  %v1031_v61 = vmul.f32 0.5, %v1027_v60 }
 0x150   :  { %v1032_v62 = vsel %vm1030_vm3, %v1027_v60, %v1031_v61 }
 0x151   :  { %v1034_v63 = vsel %vm1033_vm2, %v1032_v62, 0.0  ;;  %v1537_v48 = vsel %vm1033_vm2, %v1032_v62, 0 }
 0x152   :  { %v1035_v1 = vrot.slane %v1034_v63, 4 }
 0x154   :  { %v1036_v2 = vadd.f32 %v1035_v1, %v1034_v63 }
 0x156   :  { %v1037_v3 = vrot.slane %v1036_v2, 2 }
 0x158   :  { %v1038_v4 = vadd.f32 %v1037_v3, %v1036_v2 }
 0x15a   :  { %v1039_v5 = vrot.slane %v1038_v4, 1 }
 0x15c   :  { %v1040_v6 = vadd.f32 %v1039_v5, %v1038_v4 }
 0x15e   :  { %v1041_v7 = vmul.f32 0.125, %v1040_v6 }
 0x160   :  { %v1042_v9 = vsub.f32 %v1032_v62, %v1041_v7 }
 0x162   :  { %v1043_v13 = vmul.f32 %v1042_v9, %v1042_v9  ;;  %v49_v9 = vld [vmem:[#allocation2 + $0x5] sm:$0x1] }
 0x164   :  { %v1044_v16 = vsel %vm1033_vm2, %v1043_v13, 0.0 }
 0x165   :  { %v1045_v18 = vrot.slane %v1044_v16, 4 }
 0x167   :  { %v1046_v20 = vadd.f32 %v1045_v18, %v1044_v16 }
 0x169   :  { %v1047_v21 = vrot.slane %v1046_v20, 2 }
 0x16b   :  { %v1048_v22 = vadd.f32 %v1047_v21, %v1046_v20 }
 0x16d   :  { %v1049_v23 = vrot.slane %v1048_v22, 1 }
 0x16f   :  { %v1050_v24 = vadd.f32 %v1049_v23, %v1048_v22 }
 0x171   :  { %v1051_v25 = vmul.f32 0.125, %v1050_v24 }
 0x173   :  { %v1052_v26 = vadd.f32 1e-05, %v1051_v25 }
 0x175   :  { %2820 = vrsqrt.f32 %v1052_v26 }
 0x182   :  { %v2821_v28 = vpop.eup %2820 }
 0x183   :  { %v1054_v29 = vmul.f32 %v2821_v28, %v47_v27 }
 0x185   :  { %v1055_v31 = vmul.f32 %v1054_v29, %v1041_v7  ;;  %v1060_v32 = vrot.slane %v1054_v29, %v2968_v39 }
 0x187   :  { %v1056_v33 = vsub.f32 %v48_v30, %v1055_v31  ;;  %v1062_v34 = vmul.f32 %v1060_v32, %v3046_v8  ;;  %v1061_v35 = vmul.f32 %v1060_v32, %v3055_v12 }
 0x189   :  { %v1064_v36 = vsel %vm1033_vm2, %v1056_v33, 0  ;;  %v1543_v37 = vsel %vm1033_vm2, %v1062_v34, 0  ;;  %v1540_v42 = vsel %vm1033_vm2, %v1061_v35, 0 }
 0x18a   :  { %v1139_v38 = vand.u32 4294901760, %v1064_v36  ;;  %v3086_v40 = vand.u32 4294901760, %v1543_v37  ;;  %v1577_v43 = vand.u32 4294901760, %v1540_v42 }
 0x18c   :  { %v1140_v41 = vsub.f32 %v1064_v36, %v1139_v38  ;;  %2707 = vmatmul.mubr.f32.vlgmr.msra.gmra.mxu1 %v1139_v38  ;;  %v3094_v12 = vsub.f32 %v1543_v37, %v3086_v40  ;;  %v3099_v47 = vsub.f32 %v1540_v42, %v1577_v43 }
 0x18d   :  { %2717 = vmatpush3.xpose.msra.mxu1 %v3050_v10  ;;  %2720 = vmatprep.mubr.msk.f32.mxu1 %vm2899_vm0, %v2898_v0 }
 0x18e   :  { %2718 = vmatprep.subr.mxu1 %v2898_v0  ;;  %v1141_v8 = vand.u32 4294901760, %v1140_v41  ;;  %v1653_v46 = vand.u32 4294901760, %v3094_v12  ;;  %v1660_v50 = vand.u32 4294901760, %v3099_v47 }
 0x190   :  { %v1142_v44 = vsub.f32 %v1140_v41, %v1141_v8  ;;  %v1654_v49 = vsub.f32 %v3094_v12, %v1653_v46  ;;  %v1661_v52 = vsub.f32 %v3099_v47, %v1660_v50 }
 0x191   :  { %2719 = vmatpush3.xpose.msra.mxu1 %v3062_v15 }
 0x192   :  { %2730 = vmatprep.subr.mxu1 %v2898_v0  ;;  %v1143_v45 = vand.u32 4294901760, %v1142_v44  ;;  %v1655_v51 = vand.u32 4294901760, %v1654_v49 }
 0x194   :  { %2721 = vmatmul.mubr.f32.vlgmr.msra.gmra.mxu1 %v1141_v8  ;;  %2700 = vmatmul.mubr.f32.vlgmr.msra.gmra.mxu0 %v1143_v45 }
 0x195   :  { %2710 = vmatpush3.xpose.msra.mxu0 %v3053_v11  ;;  %2731 = vmatpush3.xpose.msra.mxu1 %v3050_v10  ;;  %v1612_v10 = vand.u32 4294901760, %v1537_v48 }
 0x196   :  { %2711 = vmatprep.subr.mxu0 %v2898_v0  ;;  %2732 = vmatprep.subr.mxu1 %v2898_v0 }
 0x197   :  { %2713 = vmatprep.mubr.msk.f32.mxu0 %vm2899_vm0, %v2898_v0  ;;  %2734 = vmatprep.mubr.msk.f32.mxu1 %vm2899_vm0, %v2898_v0  ;;  %v1613_v53 = vsub.f32 %v1537_v48, %v1612_v10 }
 0x199   :  { %2712 = vmatpush3.xpose.msra.mxu0 %v3068_v17  ;;  %2733 = vmatpush3.xpose.msra.mxu1 %v3062_v15  ;;  %v1662_v15 = vand.u32 4294901760, %v1661_v52  ;;  %v1614_v11 = vand.u32 4294901760, %v1613_v53 }
 0x19a   :  { %2723 = vmatprep.subr.mxu0 %v2898_v0  ;;  %2744 = vmatprep.subr.mxu1 %v2898_v0 }
 0x19c   :  { %2714 = vmatmul.mubr.f32.vlgmr.msra.gmra.mxu0 %v1140_v41  ;;  %2735 = vmatmul.mubr.f32.vlgmr.msra.gmra.mxu1 %v1139_v38 }
 0x19d   :  { %2724 = vmatpush3.xpose.msra.mxu0 %v1180_v14  ;;  %2745 = vmatpush3.xpose.msra.mxu1 %v1655_v51  ;;  %v1615_v14 = vsub.f32 %v1613_v53, %v1614_v11 }
 0x19e   :  { %2725 = vmatprep.subr.mxu0 %v2898_v0  ;;  %2746 = vmatprep.subr.mxu1 %v2898_v0 }
 0x19f   :  { %2727 = vmatprep.mubr.msk.f32.mxu0 %vm2899_vm0, %v2898_v0  ;;  %2748 = vmatprep.mubr.msk.f32.mxu1 %vm2899_vm0, %v2898_v0  ;;  %v1616_v17 = vand.u32 4294901760, %v1615_v14 }
 0x1a1   :  { %2726 = vmatpush3.xpose.msra.mxu0 %v1187_v19  ;;  %2747 = vmatpush3.xpose.msra.mxu1 %v1662_v15 }
 0x1a2   :  { %2737 = vmatprep.subr.mxu0 %v2898_v0  ;;  %2758 = vmatprep.subr.mxu1 %v2898_v0 }
 0x1a4   :  { %2728 = vmatmul.mubr.f32.vlgmr.msra.gmra.mxu0 %v1139_v38  ;;  %2749 = vmatmul.mubr.f32.vlgmr.msra.gmra.mxu1 %v1612_v10 }
 0x1a5   :  { %2738 = vmatpush3.xpose.msra.mxu0 %v3086_v40  ;;  %2759 = vmatpush3.xpose.msra.mxu1 %v3086_v40 }
 0x1a6   :  { %2739 = vmatprep.subr.mxu0 %v2898_v0  ;;  %2760 = vmatprep.subr.mxu1 %v2898_v0 }
 0x1a7   :  { %2741 = vmatprep.mubr.msk.f32.mxu0 %vm2899_vm0, %v2898_v0  ;;  %2762 = vmatprep.mubr.msk.f32.mxu1 %vm2899_vm0, %v2898_v0 }
 0x1a9   :  { %2740 = vmatpush3.xpose.msra.mxu0 %v1577_v43  ;;  %2761 = vmatpush3.xpose.msra.mxu1 %v1577_v43 }
 0x1aa   :  { %2751 = vmatprep.subr.mxu0 %v2898_v0  ;;  %2772 = vmatprep.subr.mxu1 %v2898_v0 }
 0x1ac   :  { %2742 = vmatmul.mubr.f32.vlgmr.msra.gmra.mxu0 %v1616_v17  ;;  %2763 = vmatmul.mubr.f32.vlgmr.msra.gmra.mxu1 %v1614_v11 }
 0x1ad   :  { %2752 = vmatpush3.xpose.msra.mxu0 %v3094_v12  ;;  %2773 = vmatpush3.xpose.msra.mxu1 %v3086_v40 }
 0x1ae   :  { %2753 = vmatprep.subr.mxu0 %v2898_v0  ;;  %2774 = vmatprep.subr.mxu1 %v2898_v0 }
 0x1af   :  { %2755 = vmatprep.mubr.msk.f32.mxu0 %vm2899_vm0, %v2898_v0  ;;  %2776 = vmatprep.mubr.msk.f32.mxu1 %vm2899_vm0, %v2898_v0 }
 0x1b1   :  { %2754 = vmatpush3.xpose.msra.mxu0 %v3099_v47  ;;  %2775 = vmatpush3.xpose.msra.mxu1 %v1577_v43 }
 0x1b2   :  { %2765 = vmatprep.subr.mxu0 %v2898_v0  ;;  %2784 = vmatprep.subr.mxu1 %v2898_v0 }
 0x1b4   :  { %2756 = vmatmul.mubr.f32.vlgmr.msra.gmra.mxu0 %v1613_v53  ;;  %2777 = vmatmul.mubr.f32.vlgmr.msra.gmra.mxu1 %v1612_v10 }
 0x1b5   :  { %2766 = vmatpush3.xpose.msra.mxu0 %v1653_v46  ;;  %2769 = vmatprep.mubr.msk.f32.mxu0 %vm2899_vm0, %v2898_v0 }
 0x1b6   :  { %2767 = vmatprep.subr.mxu0 %v2898_v0  ;;  %2786 = vmatprep.mubr.msk.f32.mxu1 %vm2899_vm0, %v2898_v0 }
 0x1b9   :  { %2768 = vmatpush3.xpose.msra.mxu0 %v1660_v50 }
 0x1ba   :  { %2779 = vmatprep.subr.mxu0 %v2898_v0 }
 0x1bc   :  { %2770 = vmatmul.mubr.f32.vlgmr.msra.gmra.mxu0 %v1612_v10 }
 0x1bd   :  { %2781 = vmatprep.mubr.msk.f32.mxu0 %vm2899_vm0, %v2898_v0 }
 0x24c   :  { %v1226_v19 = vpop.f32.mrf.mxu1 }
 0x24e   :  { %v2708_v54 = vpop.f32.mrf.mxu1 }
 0x254   :  { %v1377_v55 = vpop.f32.mrf.mxu1  ;;  %v1145_v56 = vpop.f32.mrf.mxu0 }
 0x255   :  { %v1227_v61 = vadd.f32 %v1226_v19, %v1145_v56 }
 0x256   :  { %v2722_v57 = vpop.f32.mrf.mxu1  ;;  %v2701_v58 = vpop.f32.mrf.mxu0 }
 0x257   :  { %v57_v57 = vld [vmem:[#allocation5 + $0x20] sm:$0x1] }
 0x25c   :  { %v1302_v59 = vpop.f32.mrf.mxu0  ;;  %v1527_v60 = vpop.f32.mrf.mxu1 }
 0x25d   :  { %v1303_v1 = vadd.f32 %v1302_v59, %v1227_v61  ;;  %v51_v59 = vld [vmem:[#allocation2 + $0x7] sm:$0x1] }
 0x25e   :  { %v2715_v62 = vpop.f32.mrf.mxu0  ;;  %v2736_v63 = vpop.f32.mrf.mxu1 }
 0x25f   :  { %v1378_v2 = vadd.f32 %v1377_v55, %v1303_v1  ;;  %v50_v55 = vld [vmem:[#allocation2 + $0x6] sm:$0x1] }
 0x264   :  { %v1454_v3 = vpop.f32.mrf.mxu0  ;;  %v1699_v4 = vpop.f32.mrf.mxu1 }
 0x265   :  { %v1455_v5 = vadd.f32 %v1454_v3, %v1378_v2 }
 0x266   :  { %v2729_v6 = vpop.f32.mrf.mxu0  ;;  %v2750_v7 = vpop.f32.mrf.mxu1 }
 0x267   :  { %v1528_v13 = vadd.f32 %v1527_v60, %v1455_v5 }
 0x269   :  { %v1531_v16 = vadd.f32 %v1528_v13, %v49_v9  ;;  %v2900_v9 = vmov 0   ;;  %v52_v13 = vld [vmem:[#allocation2 + $0x8] sm:$0x1] }
 0x26a   :  { %2817 = vset.pattern.permute.xlu0 %v2900_v9 }
 0x26b   :  { %v1535_v21 = vrot.slane %v1531_v16, %v2968_v39 }
 0x26c   :  { %v1618_v18 = vpop.f32.mrf.mxu0  ;;  %v1850_v20 = vpop.f32.mrf.mxu1 }
 0x26d   :  { %v1619_v24 = vadd.f32 %v1618_v18, %v1535_v21 }
 0x26e   :  { %v2743_v22 = vpop.f32.mrf.mxu0  ;;  %v2764_v23 = vpop.f32.mrf.mxu1 }
 0x26f   :  { %v1700_v27 = vadd.f32 %v1699_v4, %v1619_v24 }
 0x274   :  { %v1775_v25 = vpop.f32.mrf.mxu0  ;;  %v2000_v26 = vpop.f32.mrf.mxu1 }
 0x275   :  { %v1776_v30 = vadd.f32 %v1775_v25, %v1700_v27 }
 0x276   :  { %v2757_v28 = vpop.f32.mrf.mxu0  ;;  %v2778_v29 = vpop.f32.mrf.mxu1 }
 0x277   :  { %v1851_v31 = vadd.f32 %v1850_v20, %v1776_v30 }
 0x27c   :  { %v1927_v32 = vpop.f32.mrf.mxu0 }
 0x27d   :  { %v1928_v33 = vadd.f32 %v1927_v32, %v1851_v31 }
 0x27e   :  { %v2771_v34 = vpop.f32.mrf.mxu0 }
 0x27f   :  { %v2001_v35 = vadd.f32 %v2000_v26, %v1928_v33 }
 0x281   :  { %vm2004_vm4 = vcmp.ge.f32.partialorder %v2001_v35, 0.0  ;;  %v2005_v36 = vmul.f32 0.5, %v2001_v35 }
 0x283   :  { %v2006_v37 = vsel %vm2004_vm4, %v2001_v35, %v2005_v36 }
 0x284   :  { %v2007_v38 = vsel %vm1033_vm2, %v2006_v37, 0.0  ;;  %v2046_v39 = vsel %vm1033_vm2, %v2006_v37, 0 }
 0x285   :  { %v2008_v40 = vrot.slane %v2007_v38, 4  ;;  %v2079_v41 = vand.u32 4294901760, %v2046_v39 }
 0x287   :  { %v2009_v42 = vadd.f32 %v2008_v40, %v2007_v38  ;;  %2780 = vmatpush3.xpose.msra.mxu0 %v2079_v41  ;;  %v2156_v8 = vsub.f32 %v2046_v39, %v2079_v41 }
 0x288   :  { %2789 = vmatprep.subr.mxu0 %v2898_v0 }
 0x289   :  { %v2010_v12 = vrot.slane %v2009_v42, 2  ;;  %v2157_v43 = vand.u32 4294901760, %v2156_v8 }
 0x28b   :  { %v2011_v44 = vadd.f32 %v2010_v12, %v2009_v42  ;;  %v2158_v45 = vsub.f32 %v2156_v8, %v2157_v43 }
 0x28d   :  { %v2012_v46 = vrot.slane %v2011_v44, 1  ;;  %v2159_v47 = vand.u32 4294901760, %v2158_v45 }
 0x28f   :  { %v2013_v48 = vadd.f32 %v2012_v46, %v2011_v44  ;;  %2785 = vmatpush3.xpose.msra.mxu1 %v2159_v47 }
 0x290   :  { %2794 = vmatprep.subr.mxu1 %v2898_v0 }
 0x291   :  { %v2014_v49 = vmul.f32 0.125, %v2013_v48 }
 0x293   :  { %v2015_v50 = vsub.f32 %v2006_v37, %v2014_v49 }
 0x295   :  { %v2016_v10 = vmul.f32 %v2015_v50, %v2015_v50 }
 0x297   :  { %v2017_v51 = vsel %vm1033_vm2, %v2016_v10, 0.0 }
 0x298   :  { %v2018_v52 = vrot.slane %v2017_v51, 4 }
 0x29a   :  { %v2019_v53 = vadd.f32 %v2018_v52, %v2017_v51 }
 0x29c   :  { %v2020_v15 = vrot.slane %v2019_v53, 2 }
 0x29e   :  { %v2021_v11 = vadd.f32 %v2020_v15, %v2019_v53 }
 0x2a0   :  { %v2022_v14 = vrot.slane %v2021_v11, 1 }
 0x2a2   :  { %v2023_v17 = vadd.f32 %v2022_v14, %v2021_v11 }
 0x2a4   :  { %v2024_v19 = vmul.f32 0.125, %v2023_v17 }
 0x2a6   :  { %v2025_v54 = vadd.f32 1e-05, %v2024_v19 }
 0x2a8   :  { %2822 = vrsqrt.f32 %v2025_v54 }
 0x2b5   :  { %v2823_v56 = vpop.eup %2822 }
 0x2b6   :  { %v2027_v58 = vmul.f32 %v2823_v56, %v50_v55 }
 0x2b8   :  { %v2030_v60 = vmul.f32 %v2027_v58, %v57_v57  ;;  %v2028_v61 = vmul.f32 %v2027_v58, %v2014_v49 }
 0x2ba   :  { %v2043_v62 = vsel %vm1033_vm2, %v2030_v60, 0  ;;  %v2029_v63 = vsub.f32 %v51_v59, %v2028_v61 }
 0x2bb   :  { %v2114_v1 = vand.u32 4294901760, %v2043_v62 }
 0x2bc   :  { %v2031_v2 = vmul.f32 %v2029_v63, %v57_v57 }
 0x2bd   :  { %v2115_v3 = vsub.f32 %v2043_v62, %v2114_v1  ;;  %2787 = vmatmul.mubr.f32.vlgmr.msra.gmra.mxu1 %v2114_v1 }
 0x2be   :  { %2795 = vmatpush3.xpose.msra.mxu1 %v2079_v41  ;;  %v2033_v4 = vsel %vm2032_vm5, %v2031_v2, 0.0  ;;  %2796 = vmatprep.mubr.msk.f32.mxu1 %vm2899_vm0, %v2898_v0 }
 0x2bf   :  { %2034 = vadd.xlane.f32.xlu0 %v2033_v4  ;;  %2804 = vmatprep.subr.mxu1 %v2898_v0  ;;  %v2116_v5 = vand.u32 4294901760, %v2115_v3 }
 0x2c1   :  { %2797 = vmatmul.mubr.f32.vlgmr.msra.gmra.mxu1 %v2116_v5  ;;  %v2117_v6 = vsub.f32 %v2115_v3, %v2116_v5 }
 0x2c2   :  { %2805 = vmatpush3.xpose.msra.mxu1 %v2079_v41  ;;  %2806 = vmatprep.mubr.msk.f32.mxu1 %vm2899_vm0, %v2898_v0 }
 0x2c3   :  { %v2118_v7 = vand.u32 4294901760, %v2117_v6 }
 0x2c5   :  { %2782 = vmatmul.mubr.f32.vlgmr.msra.gmra.mxu0 %v2118_v7  ;;  %2807 = vmatmul.mubr.f32.vlgmr.msra.gmra.mxu1 %v2114_v1 }
 0x2c6   :  { %2790 = vmatpush3.xpose.msra.mxu0 %v2156_v8  ;;  %2791 = vmatprep.mubr.msk.f32.mxu0 %vm2899_vm0, %v2898_v0 }
 0x2c7   :  { %2799 = vmatprep.subr.mxu0 %v2898_v0 }
 0x2c9   :  { %2792 = vmatmul.mubr.f32.vlgmr.msra.gmra.mxu0 %v2115_v3 }
 0x2ca   :  { %2800 = vmatpush3.xpose.msra.mxu0 %v2157_v43  ;;  %2801 = vmatprep.mubr.msk.f32.mxu0 %vm2899_vm0, %v2898_v0 }
 0x2cd   :  { %2802 = vmatmul.mubr.f32.vlgmr.msra.gmra.mxu0 %v2114_v1 }
 0x348   :  { %v2035_v16 = vpop.xlane.xlu0 %2034 }
 0x349   :  { %v2036_v18 = vadd.f32 %v2035_v16, %v52_v13 }
 0x34b   :  { %2039 = vperm.xlu0 %2817, %v2036_v18  }
 0x37d   :  { %v2196_v20 = vpop.f32.mrf.mxu1 }
 0x37f   :  { %v2788_v21 = vpop.f32.mrf.mxu1 }
 0x381   :  { %v2344_v22 = vpop.f32.mrf.mxu1 }
 0x383   :  { %v2798_v23 = vpop.f32.mrf.mxu1 }
 0x385   :  { %v2120_v24 = vpop.f32.mrf.mxu0  ;;  %v2490_v25 = vpop.f32.mrf.mxu1 }
 0x387   :  { %v2783_v26 = vpop.f32.mrf.mxu0  ;;  %v2808_v27 = vpop.f32.mrf.mxu1 }
 0x389   :  { %v2270_v28 = vpop.f32.mrf.mxu0 }
 0x38b   :  { %v2793_v29 = vpop.f32.mrf.mxu0 }
 0x38d   :  { %v2418_v30 = vpop.f32.mrf.mxu0 }
 0x38f   :  { %v2803_v31 = vpop.f32.mrf.mxu0 }
 0x3c6   :  { %v2040_v0 = vpop.permute.xlu0 %2039 }
 0x3c7   :  { %v2121_v32 = vadd.f32 %v2120_v24, %v2040_v0 }
 0x3c9   :  { %v2197_v33 = vadd.f32 %v2196_v20, %v2121_v32 }
 0x3cb   :  { %v2271_v34 = vadd.f32 %v2270_v28, %v2197_v33 }
 0x3cd   :  { %v2345_v35 = vadd.f32 %v2344_v22, %v2271_v34 }
 0x3cf   :  { %v2419_v36 = vadd.f32 %v2418_v30, %v2345_v35 }
 0x3d1   :  { %v2491_v37 = vadd.f32 %v2490_v25, %v2419_v36 }
 0x3d3   :  { %v2495_v38 = vand.u32 2147483647, %v2491_v37  ;;  %v2494_v47 = vmin.f32 %v2491_v37, 0.0 }
 0x3d5   :  { %v2496_v39 = vsub.f32 0.0, %v2495_v38 }
 0x3d7   :  { %v2497_v40 = vmul.f32 1.442695, %v2496_v39 }
 0x3d9   :  { %2824 = vpow2.f32 %v2497_v40 }
 0x3e6   :  { %v2825_v41 = vpop.eup %2824 }
 0x3e7   :  { %v2499_v42 = vadd.f32 1.0, %v2825_v41  ;;  %v2502_v8 = vmul.f32 -0.5, %v2825_v41  ;;  %v2505_v43 = vand.u32 2147483647, %v2825_v41 }
 0x3e9   :  { %2826 = vlog2.f32 %v2499_v42  ;;  %v2503_v12 = vadd.f32 1.0, %v2502_v8  ;;  %vm2506_vm6 = vcmp.lt.f32.partialorder %v2505_v43, 0.0004427343 }
 0x3eb   :  { %v2504_v46 = vmul.f32 %v2825_v41, %v2503_v12 }
 0x3f6   :  { %v2827_v44 = vpop.eup %2826 }
 0x3f7   :  { %v2501_v45 = vmul.f32 0.6931472, %v2827_v44 }
 0x3f9   :  { %v2507_v48 = vsel %vm2506_vm6, %v2504_v46, %v2501_v45 }
 0x3fa   :  { %v2508_v49 = vsub.f32 %v2494_v47, %v2507_v48 }
 0x3fc   :  { %2510 = vst.msk [vmem:[#allocation7] sm:$0x1] %vm2509_vm7, %v2508_v49 }
 0x3fd   :  { %2879 = shalt.err (!%p2876_p0)
}
 0x3fe   :  { %2520 = dma.vmem_to_hbm [thread:$0]  %s2518_s24, 16, %s3181_s3, [#allocation4]  }
 0x3ff   :  { %2892 = dma.done.wait [#allocation4], 16  }
 0x400   :  { %2893 = vsyncadd [#allocation4], 4294967280 }
 0x401   :  { %2524 = vsyncpa [#allocation3], 1 }
 0x402   :  { %2525 = vsyncpa [#allocation6], 1 }
 0x403   :  { %2526 = vsyncpa [#allocation4], 1 }

</bundles_post_ra>
